<compile_context>
chip_gen: v5e
topology: v5e:2x2
jax: 0.10.0
libtpu: 0.0.40
codegen_flags: <defaults>
</compile_context>

<pallas_src>
import math
from functools import partial

import jax
import jax.numpy as jnp
from jax import lax
from jax.experimental import pallas as pl
from jax.experimental.pallas import tpu as pltpu


# --------------------------------------------------------------------------
# in-kernel helpers
# --------------------------------------------------------------------------
def _layernorm(x, gamma, beta, eps=1e-5):
    mu = jnp.mean(x, axis=-1, keepdims=True)
    var = jnp.mean((x - mu) ** 2, axis=-1, keepdims=True)
    return (x - mu) * lax.rsqrt(var + eps) * gamma + beta


def transformer_block_kernel(q_ref, k_ref, v_ref, vres_ref,
                             wqT_ref, bq_ref, wkT_ref, bk_ref,
                             wvT_ref, bv_ref, woT_ref, bo_ref,
                             g1_ref, be1_ref,
                             w1T_ref, b1_ref, w2T_ref, b2_ref,
                             g2_ref, be2_ref,
                             out_ref,
                             acc_ref, qh_ref,
                             *, n_heads, head_dim, compute_dtype,
                             approx_softmax):
    f32 = jnp.float32
    cd = compute_dtype
    H, hd = n_heads, head_dim
    kvi = pl.program_id(2)
    n_kv = pl.num_programs(2)
    tq = q_ref.shape[1]
    tk = k_ref.shape[1]

    def mm(a, b):
        return jnp.dot(a.astype(cd), b.astype(cd), preferred_element_type=f32)

    def project_heads(x_flat, wT_ref, b_ref, rows):
        # Head-split the flat (rows, E) activations (lane blocks stacked along
        # sublanes), then ONE 2D matmul against the shared (hd, hd) weight.
        xh = jnp.concatenate(
            [x_flat[:, h * hd:(h + 1) * hd] for h in range(H)], axis=0)
        p = mm(xh, wT_ref[...]) + b_ref[...]           # (H*rows, hd) f32
        return p.reshape(H, rows, hd)                  # leading-dim split only

    # ---- per-(b, q-tile) init on the first kv step -------------------------
    @pl.when(kvi == 0)
    def _():
        acc_ref[...] = jnp.zeros_like(acc_ref)
        # query projection is kv-invariant; 1/sqrt(hd) already folded in.
        qh_ref[...] = project_heads(q_ref[0], wqT_ref, bq_ref, tq)

    # ---- project this kv tile ----------------------------------------------
    k_h = project_heads(k_ref[0], wkT_ref, bk_ref, tk)   # (H, tk, hd)
    v_h = project_heads(v_ref[0], wvT_ref, bv_ref, tk)   # (H, tk, hd)

    # ---- batched per-head scores: (H, tq, tk) -------------------------------
    s = jnp.einsum('hqd,hkd->hqk', qh_ref[...].astype(cd), k_h.astype(cd),
                   preferred_element_type=f32)

    # softmax over the HEADS axis (faithful to F.softmax(dot, dim=1)); it is
    # local to each (q, k) pair, so kv tiles are independent -> no carry.
    m = jnp.max(s, axis=0, keepdims=True)
    e = jnp.exp(s - m)
    denom = jnp.sum(e, axis=0, keepdims=True)
    if approx_softmax:
        p = e * pl.reciprocal(denom, approx=True)      # EUP slot
    else:
        p = e / denom

    # ---- batched p @ v, accumulated across kv tiles -------------------------
    acc_ref[...] += jnp.einsum('hqk,hkd->hqd', p.astype(cd), v_h.astype(cd),
                               preferred_element_type=f32)

    # ---- epilogue on the last kv step ---------------------------------------
    @pl.when(kvi == n_kv - 1)
    def _():
        o = acc_ref[...]                                       # (H, tq, hd)
        concat = jnp.concatenate([o[h] for h in range(H)], axis=-1)  # (tq, E)
        attn = mm(concat, woT_ref[...]) + bo_ref[...]

        # residual with `value` + layernorm 1   (dropout = identity)
        x1 = _layernorm(attn + vres_ref[0], g1_ref[...], be1_ref[...])

        # feed-forward (E -> 4E -> E) + residual + layernorm 2
        h1 = jnp.maximum(mm(x1, w1T_ref[...]) + b1_ref[...], 0.0)
        ff = mm(h1, w2T_ref[...]) + b2_ref[...]
        out_ref[0] = _layernorm(ff + x1, g2_ref[...],
                                be2_ref[...]).astype(out_ref.dtype)


# --------------------------------------------------------------------------
# wrapper
# --------------------------------------------------------------------------
def _pick_tile(s, cap):
    """Largest multiple-of-8 tile <= cap that divides s evenly, else s."""
    for t in (512, 384, 256, 128, 64, 32, 16, 8):
        if t <= cap and t <= s and s % t == 0:
            return t
    # TODO(synk): ragged S (not a multiple of 8) falls back to a single full
    # tile; a padded+masked last tile would bound VMEM for long ragged seqs.
    return s


def transformer_block(key, query, value, params, n_heads,
                      compute_dtype=jnp.float32, out_dtype=None,
                      approx_softmax=True, tile_q=None, tile_kv=None):
    (wq, bq, wk, bk, wv, bv, wo, bo,
     g1, be1, w1, b1, w2, b2, g2, be2) = params
    B, S_k, E = key.shape
    S_q = query.shape[1]
    assert value.shape == key.shape
    assert S_q == S_k, "residual `attn + value` requires matching seq lengths"
    assert E % n_heads == 0
    hd = E // n_heads
    F_hidden = w1.shape[0]
    if out_dtype is None:
        out_dtype = query.dtype

    # --- host-side parameter prep: pre-transposed shared per-head weights,
    #     1/sqrt(hd) folded into the q projection (weight AND bias). ---------
    inv_sqrt = 1.0 / math.sqrt(hd)
    wqT = (wq.T * inv_sqrt).astype(compute_dtype)     # (hd, hd)
    wkT = wk.T.astype(compute_dtype)                  # (hd, hd)
    wvT = wv.T.astype(compute_dtype)                  # (hd, hd)
    woT = wo.T.astype(compute_dtype)                  # (E, E)
    w1T = w1.T.astype(compute_dtype)                  # (E, 4E)
    w2T = w2.T.astype(compute_dtype)                  # (4E, E)

    bq_f = (bq * inv_sqrt).reshape(1, hd).astype(jnp.float32)
    bk_f = bk.reshape(1, hd).astype(jnp.float32)
    bv_f = bv.reshape(1, hd).astype(jnp.float32)
    bo_f = bo.reshape(1, E).astype(jnp.float32)
    b1_f = b1.reshape(1, F_hidden).astype(jnp.float32)
    b2_f = b2.reshape(1, E).astype(jnp.float32)
    g1_f = g1.reshape(1, E).astype(jnp.float32)
    be1_f = be1.reshape(1, E).astype(jnp.float32)
    g2_f = g2.reshape(1, E).astype(jnp.float32)
    be2_f = be2.reshape(1, E).astype(jnp.float32)

    # --- VMEM budget (leave headroom for compiler scratch) & tiling ---------
    try:
        vmem_cap = pltpu.get_tpu_info().vmem_capacity_bytes
    except Exception:
        vmem_cap = 64 * 1024 * 1024          # conservative (v7x-sized) default
    vmem_limit = int(max(min(vmem_cap - 16 * 1024 * 1024,
                             100 * 1024 * 1024), 32 * 1024 * 1024))

    # bigger q tiles where VMEM allows (v5e/v6e 128 MiB -> 256; v7x 64 MiB -> 128)
    tq_cap = 256 if vmem_cap >= 96 * 1024 * 1024 else 128
    tq = tile_q if tile_q is not None else _pick_tile(S_q, tq_cap)
    tk = tile_kv if tile_kv is not None else _pick_tile(S_k, 512)
    assert S_q % tq == 0 and S_k % tk == 0, "tiles must divide the sequence"
    n_q, n_kv = S_q // tq, S_k // tk

    def rep(shape):
        nd = len(shape)
        return pl.BlockSpec(shape, lambda b, qi, ki, _n=nd: (0,) * _n)

    kernel = partial(transformer_block_kernel, n_heads=n_heads, head_dim=hd,
                     compute_dtype=compute_dtype, approx_softmax=approx_softmax)

    return pl.pallas_call(
        kernel,
        out_shape=jax.ShapeDtypeStruct((B, S_q, E), out_dtype),
        grid=(B, n_q, n_kv),
        in_specs=[
            pl.BlockSpec((1, tq, E), lambda b, qi, ki: (b, qi, 0)),   # query tile
            pl.BlockSpec((1, tk, E), lambda b, qi, ki: (b, ki, 0)),   # key kv-tile
            pl.BlockSpec((1, tk, E), lambda b, qi, ki: (b, ki, 0)),   # value kv-tile
            pl.BlockSpec((1, tq, E), lambda b, qi, ki: (b, qi, 0)),   # value rows (residual)
            rep((hd, hd)), rep((1, hd)),              # WqT (scaled), bq (scaled)
            rep((hd, hd)), rep((1, hd)),              # WkT, bk
            rep((hd, hd)), rep((1, hd)),              # WvT, bv
            rep((E, E)), rep((1, E)),                 # WoT, bo
            rep((1, E)), rep((1, E)),                 # gamma1, beta1
            rep((E, F_hidden)), rep((1, F_hidden)),   # W1T, b1
            rep((F_hidden, E)), rep((1, E)),          # W2T, b2
            rep((1, E)), rep((1, E)),                 # gamma2, beta2
        ],
        out_specs=pl.BlockSpec((1, tq, E), lambda b, qi, ki: (b, qi, 0)),
        scratch_shapes=[pltpu.VMEM((n_heads, tq, hd), jnp.float32),   # p@v accumulator
                        pltpu.VMEM((n_heads, tq, hd), jnp.float32)],  # cached q projection
        compiler_params=pltpu.CompilerParams(
            dimension_semantics=("parallel", "parallel", "arbitrary"),
            vmem_limit_bytes=vmem_limit),
    )(query, key, value, value,
      wqT, bq_f, wkT, bk_f, wvT, bv_f, woT, bo_f,
      g1_f, be1_f, w1T, b1_f, w2T, b2_f, g2_f, be2_f)


# --------------------------------------------------------------------------
# pure-JAX reference (mirrors the PyTorch code literally) for verification
# --------------------------------------------------------------------------
def _transformer_block_ref(key, query, value, params, n_heads):
    (wq, bq, wk, bk, wv, bv, wo, bo,
     g1, be1, w1, b1, w2, b2, g2, be2) = params
    B, S_k, E = key.shape
    S_q = query.shape[1]
    hd = E // n_heads

    k = key.reshape(B, S_k, n_heads, hd) @ wk.T + bk
    q = query.reshape(B, S_q, n_heads, hd) @ wq.T + bq
    v = value.reshape(B, S_k, n_heads, hd) @ wv.T + bv
    k = jnp.transpose(k, (0, 2, 1, 3))
    q = jnp.transpose(q, (0, 2, 1, 3))
    v = jnp.transpose(v, (0, 2, 1, 3))
    dot = jnp.einsum('bhqd,bhkd->bhqk', q, k) / math.sqrt(hd)
    scores = jax.nn.softmax(dot, axis=1)            # dim=1 == heads axis
    o = jnp.einsum('bhqk,bhkd->bhqd', scores, v)
    concat = jnp.transpose(o, (0, 2, 1, 3)).reshape(B, S_q, E)
    attn = concat @ wo.T + bo

    def ln(y, g, b):
        mu = y.mean(-1, keepdims=True)
        var = ((y - mu) ** 2).mean(-1, keepdims=True)
        return (y - mu) / jnp.sqrt(var + 1e-5) * g + b

    x = attn + value
    x = ln(x, g1, be1)
    ff = jnp.maximum(x @ w1.T + b1, 0.0) @ w2.T + b2
    x = ff + x
    return ln(x, g2, be2)


# --------------------------------------------------------------------------
if __name__ == "__main__":
    B, E, H = 2, 32, 4
    hd = E // H
    F_hidden = 4 * E

    rng = jax.random.PRNGKey(0)
    kparam, kdata = jax.random.split(rng)
    ks = jax.random.split(kparam, 16)
    params = (
        0.2 * jax.random.normal(ks[0], (hd, hd), jnp.float32),        # Wq
        0.1 * jax.random.normal(ks[1], (hd,), jnp.float32),           # bq
        0.2 * jax.random.normal(ks[2], (hd, hd), jnp.float32),        # Wk
        0.1 * jax.random.normal(ks[3], (hd,), jnp.float32),           # bk
        0.2 * jax.random.normal(ks[4], (hd, hd), jnp.float32),        # Wv
        0.1 * jax.random.normal(ks[5], (hd,), jnp.float32),           # bv
        0.1 * jax.random.normal(ks[6], (E, E), jnp.float32),          # Wo
        0.1 * jax.random.normal(ks[7], (E,), jnp.float32),            # bo
        1.0 + 0.1 * jax.random.normal(ks[8], (E,), jnp.float32),      # gamma1
        0.1 * jax.random.normal(ks[9], (E,), jnp.float32),            # beta1
        0.1 * jax.random.normal(ks[10], (F_hidden, E), jnp.float32),  # W1
        0.1 * jax.random.normal(ks[11], (F_hidden,), jnp.float32),    # b1
        0.1 * jax.random.normal(ks[12], (E, F_hidden), jnp.float32),  # W2
        0.1 * jax.random.normal(ks[13], (E,), jnp.float32),           # b2
        1.0 + 0.1 * jax.random.normal(ks[14], (E,), jnp.float32),     # gamma2
        0.1 * jax.random.normal(ks[15], (E,), jnp.float32),           # beta2
    )

    def make_inputs(seq):
        kk = jax.random.fold_in(kdata, seq)
        k1, k2, k3 = jax.random.split(kk, 3)
        return (jax.random.normal(k1, (B, seq, E), jnp.float32),
                jax.random.normal(k2, (B, seq, E), jnp.float32),
                jax.random.normal(k3, (B, seq, E), jnp.float32))

    # --- test 1: single-tile path (S=8), f32 compute, approx softmax recip --
    key_t, query_t, value_t = make_inputs(8)
    ref = _transformer_block_ref(key_t, query_t, value_t, params, H)
    out = jax.block_until_ready(
        transformer_block(key_t, query_t, value_t, params, H))
    assert out.shape == (B, 8, E)
    assert jnp.allclose(out, ref, atol=5e-3, rtol=5e-3), \
        f"f32 max abs err = {jnp.max(jnp.abs(out - ref))}"

    # --- test 2: tiled q / kv grid with accumulation (S=16, grid 2x2x2),
    #             exact softmax reciprocal ----------------------------------
    key2, query2, value2 = make_inputs(16)
    ref2 = _transformer_block_ref(key2, query2, value2, params, H)
    out2 = jax.block_until_ready(
        transformer_block(key2, query2, value2, params, H,
                          approx_softmax=False, tile_q=8, tile_kv=8))
    assert out2.shape == (B, 16, E)
    assert jnp.allclose(out2, ref2, atol=5e-3, rtol=5e-3), \
        f"tiled max abs err = {jnp.max(jnp.abs(out2 - ref2))}"

    # --- test 3: bf16 matmul-boundary compute (f32 accumulation) ------------
    out3 = jax.block_until_ready(
        transformer_block(key2, query2, value2, params, H,
                          compute_dtype=jnp.bfloat16, tile_q=8, tile_kv=8))
    assert jnp.allclose(out3, ref2, atol=1e-1, rtol=1e-1), \
        f"bf16 max abs err = {jnp.max(jnp.abs(out3 - ref2))}"

    print("KERNEL_OK")
</pallas_src>

<mosaic_0001>
module attributes {stable_mosaic.version = 11 : i64} {
  func.func @transformer_block_kernel(%arg0: i32, %arg1: i32, %arg2: i32, %arg3: memref<1x8x32xf32, #tpu.memory_space<vmem>>, %arg4: memref<1x8x32xf32, #tpu.memory_space<vmem>>, %arg5: memref<1x8x32xf32, #tpu.memory_space<vmem>>, %arg6: memref<1x8x32xf32, #tpu.memory_space<vmem>>, %arg7: memref<8x8xf32, #tpu.memory_space<vmem>>, %arg8: memref<1x8xf32, #tpu.memory_space<vmem>>, %arg9: memref<8x8xf32, #tpu.memory_space<vmem>>, %arg10: memref<1x8xf32, #tpu.memory_space<vmem>>, %arg11: memref<8x8xf32, #tpu.memory_space<vmem>>, %arg12: memref<1x8xf32, #tpu.memory_space<vmem>>, %arg13: memref<32x32xf32, #tpu.memory_space<vmem>>, %arg14: memref<1x32xf32, #tpu.memory_space<vmem>>, %arg15: memref<1x32xf32, #tpu.memory_space<vmem>>, %arg16: memref<1x32xf32, #tpu.memory_space<vmem>>, %arg17: memref<32x128xf32, #tpu.memory_space<vmem>>, %arg18: memref<1x128xf32, #tpu.memory_space<vmem>>, %arg19: memref<128x32xf32, #tpu.memory_space<vmem>>, %arg20: memref<1x32xf32, #tpu.memory_space<vmem>>, %arg21: memref<1x32xf32, #tpu.memory_space<vmem>>, %arg22: memref<1x32xf32, #tpu.memory_space<vmem>>, %arg23: memref<1x8x32xf32, #tpu.memory_space<vmem>>, %arg24: memref<4x8x8xf32, #tpu.memory_space<vmem>>, %arg25: memref<4x8x8xf32, #tpu.memory_space<vmem>>) attributes {dimension_semantics = [#tpu.dimension_semantics<parallel>, #tpu.dimension_semantics<parallel>, #tpu.dimension_semantics<arbitrary>], iteration_bounds = array<i64: 2, 1, 1>, scalar_prefetch = 0 : i64, scratch_operands = 2 : i64, tpu.core_type = #tpu.core_type<tc>, window_params = [{transform_indices = @transform_0, window_bounds = array<i64: 1, 8, 32>}, {transform_indices = @transform_1, window_bounds = array<i64: 1, 8, 32>}, {transform_indices = @transform_2, window_bounds = array<i64: 1, 8, 32>}, {transform_indices = @transform_3, window_bounds = array<i64: 1, 8, 32>}, {pipeline_mode = #tpu.pipeline_mode<synchronous>, transform_indices = @transform_4, window_bounds = array<i64: 8, 8>}, {pipeline_mode = #tpu.pipeline_mode<synchronous>, transform_indices = @transform_5, window_bounds = array<i64: 1, 8>}, {pipeline_mode = #tpu.pipeline_mode<synchronous>, transform_indices = @transform_6, window_bounds = array<i64: 8, 8>}, {pipeline_mode = #tpu.pipeline_mode<synchronous>, transform_indices = @transform_7, window_bounds = array<i64: 1, 8>}, {pipeline_mode = #tpu.pipeline_mode<synchronous>, transform_indices = @transform_8, window_bounds = array<i64: 8, 8>}, {pipeline_mode = #tpu.pipeline_mode<synchronous>, transform_indices = @transform_9, window_bounds = array<i64: 1, 8>}, {pipeline_mode = #tpu.pipeline_mode<synchronous>, transform_indices = @transform_10, window_bounds = array<i64: 32, 32>}, {pipeline_mode = #tpu.pipeline_mode<synchronous>, transform_indices = @transform_11, window_bounds = array<i64: 1, 32>}, {pipeline_mode = #tpu.pipeline_mode<synchronous>, transform_indices = @transform_12, window_bounds = array<i64: 1, 32>}, {pipeline_mode = #tpu.pipeline_mode<synchronous>, transform_indices = @transform_13, window_bounds = array<i64: 1, 32>}, {pipeline_mode = #tpu.pipeline_mode<synchronous>, transform_indices = @transform_14, window_bounds = array<i64: 32, 128>}, {pipeline_mode = #tpu.pipeline_mode<synchronous>, transform_indices = @transform_15, window_bounds = array<i64: 1, 128>}, {pipeline_mode = #tpu.pipeline_mode<synchronous>, transform_indices = @transform_16, window_bounds = array<i64: 128, 32>}, {pipeline_mode = #tpu.pipeline_mode<synchronous>, transform_indices = @transform_17, window_bounds = array<i64: 1, 32>}, {pipeline_mode = #tpu.pipeline_mode<synchronous>, transform_indices = @transform_18, window_bounds = array<i64: 1, 32>}, {pipeline_mode = #tpu.pipeline_mode<synchronous>, transform_indices = @transform_19, window_bounds = array<i64: 1, 32>}, {transform_indices = @transform_20, window_bounds = array<i64: 1, 8, 32>}]} {
    %c0_i32 = arith.constant 0 : i32
    %0 = arith.cmpi eq, %arg2, %c0_i32 : i32
    %1 = arith.extui %0 : i1 to i32
    %c0_i32_0 = arith.constant 0 : i32
    %2 = arith.cmpi ne, %1, %c0_i32_0 : i32
    scf.if %2 {
      %cst_30 = arith.constant 0.000000e+00 : f32
      %48 = vector.broadcast %cst_30 : f32 to vector<4x8x8xf32>
      %c0_31 = arith.constant 0 : index
      %c0_32 = arith.constant 0 : index
      %c0_33 = arith.constant 0 : index
      %49 = vector.load %arg24[%c0_31, %c0_32, %c0_33] : memref<4x8x8xf32, #tpu.memory_space<vmem>>, vector<4x8x8xf32>
      tpu.vector_store %arg24[%c0_31, %c0_32, %c0_33], %48 {strides = array<i32>} : memref<4x8x8xf32, #tpu.memory_space<vmem>>, vector<4x8x8xf32>,
      %c0_34 = arith.constant 0 : index
      %c0_35 = arith.constant 0 : index
      %c0_36 = arith.constant 0 : index
      %50 = vector.load %arg3[%c0_34, %c0_35, %c0_36] : memref<1x8x32xf32, #tpu.memory_space<vmem>>, vector<1x8x32xf32>
      %51 = vector.shape_cast %50 : vector<1x8x32xf32> to vector<8x32xf32>
      %52 = vector.extract_strided_slice %51 {offsets = [0, 0], sizes = [8, 8], strides = [1, 1]} : vector<8x32xf32> to vector<8x8xf32>
      %53 = vector.extract_strided_slice %51 {offsets = [0, 8], sizes = [8, 8], strides = [1, 1]} : vector<8x32xf32> to vector<8x8xf32>
      %54 = vector.extract_strided_slice %51 {offsets = [0, 16], sizes = [8, 8], strides = [1, 1]} : vector<8x32xf32> to vector<8x8xf32>
      %55 = vector.extract_strided_slice %51 {offsets = [0, 24], sizes = [8, 8], strides = [1, 1]} : vector<8x32xf32> to vector<8x8xf32>
      %56 = tpu.concatenate %52, %53, %54, %55 in 0 : vector<8x8xf32>, vector<8x8xf32>, vector<8x8xf32>, vector<8x8xf32> -> vector<32x8xf32>
      %c0_37 = arith.constant 0 : index
      %c0_38 = arith.constant 0 : index
      %57 = vector.load %arg7[%c0_37, %c0_38] : memref<8x8xf32, #tpu.memory_space<vmem>>, vector<8x8xf32>
      %cst_39 = arith.constant dense<0.000000e+00> : vector<32x8xf32>
      %58 = tpu.matmul %56, %57, %cst_39 {dimension_numbers = #tpu.dot_dimension_numbers<[1], [0], [0], [1], [0, 0, 1, 1], [], []>} : vector<32x8xf32>, vector<8x8xf32>, vector<32x8xf32> -> vector<32x8xf32>
      %c0_40 = arith.constant 0 : index
      %c0_41 = arith.constant 0 : index
      %59 = vector.load %arg8[%c0_40, %c0_41] : memref<1x8xf32, #tpu.memory_space<vmem>>, vector<1x8xf32>
      %60 = vector.broadcast %59 : vector<1x8xf32> to vector<32x8xf32>
      %61 = arith.addf %58, %60 : vector<32x8xf32>
      %62 = vector.shape_cast %61 : vector<32x8xf32> to vector<4x8x8xf32>
      %c0_42 = arith.constant 0 : index
      %c0_43 = arith.constant 0 : index
      %c0_44 = arith.constant 0 : index
      %63 = vector.load %arg25[%c0_42, %c0_43, %c0_44] : memref<4x8x8xf32, #tpu.memory_space<vmem>>, vector<4x8x8xf32>
      tpu.vector_store %arg25[%c0_42, %c0_43, %c0_44], %62 {strides = array<i32>} : memref<4x8x8xf32, #tpu.memory_space<vmem>>, vector<4x8x8xf32>,
    } else {
    }
    %c0 = arith.constant 0 : index
    %c0_1 = arith.constant 0 : index
    %c0_2 = arith.constant 0 : index
    %3 = vector.load %arg4[%c0, %c0_1, %c0_2] : memref<1x8x32xf32, #tpu.memory_space<vmem>>, vector<1x8x32xf32>
    %4 = vector.shape_cast %3 : vector<1x8x32xf32> to vector<8x32xf32>
    %5 = vector.extract_strided_slice %4 {offsets = [0, 0], sizes = [8, 8], strides = [1, 1]} : vector<8x32xf32> to vector<8x8xf32>
    %6 = vector.extract_strided_slice %4 {offsets = [0, 8], sizes = [8, 8], strides = [1, 1]} : vector<8x32xf32> to vector<8x8xf32>
    %7 = vector.extract_strided_slice %4 {offsets = [0, 16], sizes = [8, 8], strides = [1, 1]} : vector<8x32xf32> to vector<8x8xf32>
    %8 = vector.extract_strided_slice %4 {offsets = [0, 24], sizes = [8, 8], strides = [1, 1]} : vector<8x32xf32> to vector<8x8xf32>
    %9 = tpu.concatenate %5, %6, %7, %8 in 0 : vector<8x8xf32>, vector<8x8xf32>, vector<8x8xf32>, vector<8x8xf32> -> vector<32x8xf32>
    %c0_3 = arith.constant 0 : index
    %c0_4 = arith.constant 0 : index
    %10 = vector.load %arg9[%c0_3, %c0_4] : memref<8x8xf32, #tpu.memory_space<vmem>>, vector<8x8xf32>
    %cst = arith.constant dense<0.000000e+00> : vector<32x8xf32>
    %11 = tpu.matmul %9, %10, %cst {dimension_numbers = #tpu.dot_dimension_numbers<[1], [0], [0], [1], [0, 0, 1, 1], [], []>} : vector<32x8xf32>, vector<8x8xf32>, vector<32x8xf32> -> vector<32x8xf32>
    %c0_5 = arith.constant 0 : index
    %c0_6 = arith.constant 0 : index
    %12 = vector.load %arg10[%c0_5, %c0_6] : memref<1x8xf32, #tpu.memory_space<vmem>>, vector<1x8xf32>
    %13 = vector.broadcast %12 : vector<1x8xf32> to vector<32x8xf32>
    %14 = arith.addf %11, %13 : vector<32x8xf32>
    %15 = vector.shape_cast %14 : vector<32x8xf32> to vector<4x8x8xf32>
    %c0_7 = arith.constant 0 : index
    %c0_8 = arith.constant 0 : index
    %c0_9 = arith.constant 0 : index
    %16 = vector.load %arg5[%c0_7, %c0_8, %c0_9] : memref<1x8x32xf32, #tpu.memory_space<vmem>>, vector<1x8x32xf32>
    %17 = vector.shape_cast %16 : vector<1x8x32xf32> to vector<8x32xf32>
    %18 = vector.extract_strided_slice %17 {offsets = [0, 0], sizes = [8, 8], strides = [1, 1]} : vector<8x32xf32> to vector<8x8xf32>
    %19 = vector.extract_strided_slice %17 {offsets = [0, 8], sizes = [8, 8], strides = [1, 1]} : vector<8x32xf32> to vector<8x8xf32>
    %20 = vector.extract_strided_slice %17 {offsets = [0, 16], sizes = [8, 8], strides = [1, 1]} : vector<8x32xf32> to vector<8x8xf32>
    %21 = vector.extract_strided_slice %17 {offsets = [0, 24], sizes = [8, 8], strides = [1, 1]} : vector<8x32xf32> to vector<8x8xf32>
    %22 = tpu.concatenate %18, %19, %20, %21 in 0 : vector<8x8xf32>, vector<8x8xf32>, vector<8x8xf32>, vector<8x8xf32> -> vector<32x8xf32>
    %c0_10 = arith.constant 0 : index
    %c0_11 = arith.constant 0 : index
    %23 = vector.load %arg11[%c0_10, %c0_11] : memref<8x8xf32, #tpu.memory_space<vmem>>, vector<8x8xf32>
    %cst_12 = arith.constant dense<0.000000e+00> : vector<32x8xf32>
    %24 = tpu.matmul %22, %23, %cst_12 {dimension_numbers = #tpu.dot_dimension_numbers<[1], [0], [0], [1], [0, 0, 1, 1], [], []>} : vector<32x8xf32>, vector<8x8xf32>, vector<32x8xf32> -> vector<32x8xf32>
    %c0_13 = arith.constant 0 : index
    %c0_14 = arith.constant 0 : index
    %25 = vector.load %arg12[%c0_13, %c0_14] : memref<1x8xf32, #tpu.memory_space<vmem>>, vector<1x8xf32>
    %26 = vector.broadcast %25 : vector<1x8xf32> to vector<32x8xf32>
    %27 = arith.addf %24, %26 : vector<32x8xf32>
    %28 = vector.shape_cast %27 : vector<32x8xf32> to vector<4x8x8xf32>
    %c0_15 = arith.constant 0 : index
    %c0_16 = arith.constant 0 : index
    %c0_17 = arith.constant 0 : index
    %29 = vector.load %arg25[%c0_15, %c0_16, %c0_17] : memref<4x8x8xf32, #tpu.memory_space<vmem>>, vector<4x8x8xf32>
    "tpu.trace_start"() <{level = 10 : i32, message = "hqd,hkd->hqk"}> : () -> ()
    %cst_18 = arith.constant dense<0.000000e+00> : vector<4x8x8xf32>
    %30 = tpu.matmul %29, %15, %cst_18 {dimension_numbers = #tpu.dot_dimension_numbers<[2], [2], [1], [1], [0, 0, 0, 1, 1, 1], [0], [0]>} : vector<4x8x8xf32>, vector<4x8x8xf32>, vector<4x8x8xf32> -> vector<4x8x8xf32>
    "tpu.trace_stop"() : () -> ()
    %cst_19 = arith.constant dense<0xFF800000> : vector<8x8xf32>
    %31 = vector.multi_reduction <maximumf>, %30, %cst_19 [0] : vector<4x8x8xf32> to vector<8x8xf32>
    %32 = vector.shape_cast %31 : vector<8x8xf32> to vector<1x8x8xf32>
    %33 = vector.broadcast %32 : vector<1x8x8xf32> to vector<4x8x8xf32>
    %34 = arith.subf %30, %33 : vector<4x8x8xf32>
    %35 = math.exp %34 : vector<4x8x8xf32>
    %cst_20 = arith.constant dense<0.000000e+00> : vector<8x8xf32>
    %36 = vector.multi_reduction <add>, %35, %cst_20 [0] : vector<4x8x8xf32> to vector<8x8xf32>
    %37 = vector.shape_cast %36 : vector<8x8xf32> to vector<1x8x8xf32>
    %38 = tpu.reciprocal %37 {approx = true} : vector<1x8x8xf32> -> vector<1x8x8xf32>
    %39 = vector.broadcast %38 : vector<1x8x8xf32> to vector<4x8x8xf32>
    %40 = arith.mulf %35, %39 : vector<4x8x8xf32>
    %c0_21 = arith.constant 0 : index
    %c0_22 = arith.constant 0 : index
    %c0_23 = arith.constant 0 : index
    %41 = vector.load %arg24[%c0_21, %c0_22, %c0_23] : memref<4x8x8xf32, #tpu.memory_space<vmem>>, vector<4x8x8xf32>
    "tpu.trace_start"() <{level = 10 : i32, message = "hqk,hkd->hqd"}> : () -> ()
    %cst_24 = arith.constant dense<0.000000e+00> : vector<4x8x8xf32>
    %42 = tpu.matmul %40, %28, %cst_24 {dimension_numbers = #tpu.dot_dimension_numbers<[2], [1], [1], [2], [0, 0, 0, 1, 1, 2], [0], [0]>} : vector<4x8x8xf32>, vector<4x8x8xf32>, vector<4x8x8xf32> -> vector<4x8x8xf32>
    "tpu.trace_stop"() : () -> ()
    %43 = arith.addf %41, %42 : vector<4x8x8xf32>
    %c0_25 = arith.constant 0 : index
    %c0_26 = arith.constant 0 : index
    %c0_27 = arith.constant 0 : index
    %44 = vector.load %arg24[%c0_25, %c0_26, %c0_27] : memref<4x8x8xf32, #tpu.memory_space<vmem>>, vector<4x8x8xf32>
    tpu.vector_store %arg24[%c0_25, %c0_26, %c0_27], %43 {strides = array<i32>} : memref<4x8x8xf32, #tpu.memory_space<vmem>>, vector<4x8x8xf32>,
    %c0_i32_28 = arith.constant 0 : i32
    %45 = arith.cmpi eq, %arg2, %c0_i32_28 : i32
    %46 = arith.extui %45 : i1 to i32
    %c0_i32_29 = arith.constant 0 : i32
    %47 = arith.cmpi ne, %46, %c0_i32_29 : i32
    scf.if %47 {
      %c0_30 = arith.constant 0 : index
      %c0_31 = arith.constant 0 : index
      %c0_32 = arith.constant 0 : index
      %48 = vector.load %arg24[%c0_30, %c0_31, %c0_32] : memref<4x8x8xf32, #tpu.memory_space<vmem>>, vector<4x8x8xf32>
      %49 = vector.extract_strided_slice %48 {offsets = [0, 0, 0], sizes = [1, 8, 8], strides = [1, 1, 1]} : vector<4x8x8xf32> to vector<1x8x8xf32>
      %50 = vector.shape_cast %49 : vector<1x8x8xf32> to vector<8x8xf32>
      %51 = vector.extract_strided_slice %48 {offsets = [1, 0, 0], sizes = [1, 8, 8], strides = [1, 1, 1]} : vector<4x8x8xf32> to vector<1x8x8xf32>
      %52 = vector.shape_cast %51 : vector<1x8x8xf32> to vector<8x8xf32>
      %53 = vector.extract_strided_slice %48 {offsets = [2, 0, 0], sizes = [1, 8, 8], strides = [1, 1, 1]} : vector<4x8x8xf32> to vector<1x8x8xf32>
      %54 = vector.shape_cast %53 : vector<1x8x8xf32> to vector<8x8xf32>
      %55 = vector.extract_strided_slice %48 {offsets = [3, 0, 0], sizes = [1, 8, 8], strides = [1, 1, 1]} : vector<4x8x8xf32> to vector<1x8x8xf32>
      %56 = vector.shape_cast %55 : vector<1x8x8xf32> to vector<8x8xf32>
      %57 = tpu.concatenate %50, %52, %54, %56 in 1 : vector<8x8xf32>, vector<8x8xf32>, vector<8x8xf32>, vector<8x8xf32> -> vector<8x32xf32>
      %c0_33 = arith.constant 0 : index
      %c0_34 = arith.constant 0 : index
      %58 = vector.load %arg13[%c0_33, %c0_34] : memref<32x32xf32, #tpu.memory_space<vmem>>, vector<32x32xf32>
      %cst_35 = arith.constant dense<0.000000e+00> : vector<8x32xf32>
      %59 = tpu.matmul %57, %58, %cst_35 {dimension_numbers = #tpu.dot_dimension_numbers<[1], [0], [0], [1], [0, 0, 1, 1], [], []>} : vector<8x32xf32>, vector<32x32xf32>, vector<8x32xf32> -> vector<8x32xf32>
      %c0_36 = arith.constant 0 : index
      %c0_37 = arith.constant 0 : index
      %60 = vector.load %arg14[%c0_36, %c0_37] : memref<1x32xf32, #tpu.memory_space<vmem>>, vector<1x32xf32>
      %61 = vector.broadcast %60 : vector<1x32xf32> to vector<8x32xf32>
      %62 = arith.addf %59, %61 : vector<8x32xf32>
      %c0_38 = arith.constant 0 : index
      %c0_39 = arith.constant 0 : index
      %c0_40 = arith.constant 0 : index
      %63 = vector.load %arg6[%c0_38, %c0_39, %c0_40] : memref<1x8x32xf32, #tpu.memory_space<vmem>>, vector<1x8x32xf32>
      %64 = vector.shape_cast %63 : vector<1x8x32xf32> to vector<8x32xf32>
      %65 = arith.addf %62, %64 : vector<8x32xf32>
      %c0_41 = arith.constant 0 : index
      %c0_42 = arith.constant 0 : index
      %66 = vector.load %arg15[%c0_41, %c0_42] : memref<1x32xf32, #tpu.memory_space<vmem>>, vector<1x32xf32>
      %c0_43 = arith.constant 0 : index
      %c0_44 = arith.constant 0 : index
      %67 = vector.load %arg16[%c0_43, %c0_44] : memref<1x32xf32, #tpu.memory_space<vmem>>, vector<1x32xf32>
      %cst_45 = arith.constant dense<0.000000e+00> : vector<8xf32>
      %68 = vector.multi_reduction <add>, %65, %cst_45 [1] : vector<8x32xf32> to vector<8xf32>
      %69 = vector.shape_cast %68 : vector<8xf32> to vector<8x1xf32>
      %cst_46 = arith.constant 3.200000e+01 : f32
      %70 = vector.broadcast %cst_46 : f32 to vector<8x1xf32>
      %71 = arith.divf %69, %70 : vector<8x1xf32>
      %72 = vector.broadcast %71 : vector<8x1xf32> to vector<8x32xf32>
      %73 = arith.subf %65, %72 : vector<8x32xf32>
      %74 = arith.mulf %73, %73 : vector<8x32xf32>
      %cst_47 = arith.constant dense<0.000000e+00> : vector<8xf32>
      %75 = vector.multi_reduction <add>, %74, %cst_47 [1] : vector<8x32xf32> to vector<8xf32>
      %76 = vector.shape_cast %75 : vector<8xf32> to vector<8x1xf32>
      %cst_48 = arith.constant 3.200000e+01 : f32
      %77 = vector.broadcast %cst_48 : f32 to vector<8x1xf32>
      %78 = arith.divf %76, %77 : vector<8x1xf32>
      %79 = vector.broadcast %71 : vector<8x1xf32> to vector<8x32xf32>
      %80 = arith.subf %65, %79 : vector<8x32xf32>
      %cst_49 = arith.constant 9.99999974E-6 : f32
      %81 = vector.broadcast %cst_49 : f32 to vector<8x1xf32>
      %82 = arith.addf %78, %81 : vector<8x1xf32>
      %83 = math.rsqrt %82 : vector<8x1xf32>
      %84 = vector.broadcast %83 : vector<8x1xf32> to vector<8x32xf32>
      %85 = arith.mulf %80, %84 : vector<8x32xf32>
      %86 = vector.broadcast %66 : vector<1x32xf32> to vector<8x32xf32>
      %87 = arith.mulf %85, %86 : vector<8x32xf32>
      %88 = vector.broadcast %67 : vector<1x32xf32> to vector<8x32xf32>
      %89 = arith.addf %87, %88 : vector<8x32xf32>
      %c0_50 = arith.constant 0 : index
      %c0_51 = arith.constant 0 : index
      %90 = vector.load %arg17[%c0_50, %c0_51] : memref<32x128xf32, #tpu.memory_space<vmem>>, vector<32x128xf32>
      %cst_52 = arith.constant dense<0.000000e+00> : vector<8x128xf32>
      %91 = tpu.matmul %89, %90, %cst_52 {dimension_numbers = #tpu.dot_dimension_numbers<[1], [0], [0], [1], [0, 0, 1, 1], [], []>} : vector<8x32xf32>, vector<32x128xf32>, vector<8x128xf32> -> vector<8x128xf32>
      %c0_53 = arith.constant 0 : index
      %c0_54 = arith.constant 0 : index
      %92 = vector.load %arg18[%c0_53, %c0_54] : memref<1x128xf32, #tpu.memory_space<vmem>>, vector<1x128xf32>
      %93 = vector.broadcast %92 : vector<1x128xf32> to vector<8x128xf32>
      %94 = arith.addf %91, %93 : vector<8x128xf32>
      %cst_55 = arith.constant 0.000000e+00 : f32
      %95 = vector.broadcast %cst_55 : f32 to vector<8x128xf32>
      %96 = arith.maximumf %94, %95 : vector<8x128xf32>
      %c0_56 = arith.constant 0 : index
      %c0_57 = arith.constant 0 : index
      %97 = vector.load %arg19[%c0_56, %c0_57] : memref<128x32xf32, #tpu.memory_space<vmem>>, vector<128x32xf32>
      %cst_58 = arith.constant dense<0.000000e+00> : vector<8x32xf32>
      %98 = tpu.matmul %96, %97, %cst_58 {dimension_numbers = #tpu.dot_dimension_numbers<[1], [0], [0], [1], [0, 0, 1, 1], [], []>} : vector<8x128xf32>, vector<128x32xf32>, vector<8x32xf32> -> vector<8x32xf32>
      %c0_59 = arith.constant 0 : index
      %c0_60 = arith.constant 0 : index
      %99 = vector.load %arg20[%c0_59, %c0_60] : memref<1x32xf32, #tpu.memory_space<vmem>>, vector<1x32xf32>
      %100 = vector.broadcast %99 : vector<1x32xf32> to vector<8x32xf32>
      %101 = arith.addf %98, %100 : vector<8x32xf32>
      %102 = arith.addf %101, %89 : vector<8x32xf32>
      %c0_61 = arith.constant 0 : index
      %c0_62 = arith.constant 0 : index
      %103 = vector.load %arg21[%c0_61, %c0_62] : memref<1x32xf32, #tpu.memory_space<vmem>>, vector<1x32xf32>
      %c0_63 = arith.constant 0 : index
      %c0_64 = arith.constant 0 : index
      %104 = vector.load %arg22[%c0_63, %c0_64] : memref<1x32xf32, #tpu.memory_space<vmem>>, vector<1x32xf32>
      %cst_65 = arith.constant dense<0.000000e+00> : vector<8xf32>
      %105 = vector.multi_reduction <add>, %102, %cst_65 [1] : vector<8x32xf32> to vector<8xf32>
      %106 = vector.shape_cast %105 : vector<8xf32> to vector<8x1xf32>
      %cst_66 = arith.constant 3.200000e+01 : f32
      %107 = vector.broadcast %cst_66 : f32 to vector<8x1xf32>
      %108 = arith.divf %106, %107 : vector<8x1xf32>
      %109 = vector.broadcast %108 : vector<8x1xf32> to vector<8x32xf32>
      %110 = arith.subf %102, %109 : vector<8x32xf32>
      %111 = arith.mulf %110, %110 : vector<8x32xf32>
      %cst_67 = arith.constant dense<0.000000e+00> : vector<8xf32>
      %112 = vector.multi_reduction <add>, %111, %cst_67 [1] : vector<8x32xf32> to vector<8xf32>
      %113 = vector.shape_cast %112 : vector<8xf32> to vector<8x1xf32>
      %cst_68 = arith.constant 3.200000e+01 : f32
      %114 = vector.broadcast %cst_68 : f32 to vector<8x1xf32>
      %115 = arith.divf %113, %114 : vector<8x1xf32>
      %116 = vector.broadcast %108 : vector<8x1xf32> to vector<8x32xf32>
      %117 = arith.subf %102, %116 : vector<8x32xf32>
      %cst_69 = arith.constant 9.99999974E-6 : f32
      %118 = vector.broadcast %cst_69 : f32 to vector<8x1xf32>
      %119 = arith.addf %115, %118 : vector<8x1xf32>
      %120 = math.rsqrt %119 : vector<8x1xf32>
      %121 = vector.broadcast %120 : vector<8x1xf32> to vector<8x32xf32>
      %122 = arith.mulf %117, %121 : vector<8x32xf32>
      %123 = vector.broadcast %103 : vector<1x32xf32> to vector<8x32xf32>
      %124 = arith.mulf %122, %123 : vector<8x32xf32>
      %125 = vector.broadcast %104 : vector<1x32xf32> to vector<8x32xf32>
      %126 = arith.addf %124, %125 : vector<8x32xf32>
      %c0_70 = arith.constant 0 : index
      %c0_71 = arith.constant 0 : index
      %c0_72 = arith.constant 0 : index
      %127 = vector.load %arg23[%c0_70, %c0_71, %c0_72] : memref<1x8x32xf32, #tpu.memory_space<vmem>>, vector<1x8x32xf32>
      %128 = vector.shape_cast %127 : vector<1x8x32xf32> to vector<8x32xf32>
      %129 = vector.shape_cast %126 : vector<8x32xf32> to vector<1x8x32xf32>
      tpu.vector_store %arg23[%c0_70, %c0_71, %c0_72], %129 {strides = array<i32>} : memref<1x8x32xf32, #tpu.memory_space<vmem>>, vector<1x8x32xf32>,
    } else {
    }
    return
  }
  func.func @transform_0(%arg0: i32, %arg1: i32, %arg2: i32) -> (i32, i32, i32) {
    %c0_i32 = arith.constant 0 : i32
    %c0_i32_0 = arith.constant 0 : i32
    return %arg0, %arg1, %c0_i32 : i32, i32, i32
  }
  func.func @transform_1(%arg0: i32, %arg1: i32, %arg2: i32) -> (i32, i32, i32) {
    %c0_i32 = arith.constant 0 : i32
    %c0_i32_0 = arith.constant 0 : i32
    return %arg0, %arg2, %c0_i32 : i32, i32, i32
  }
  func.func @transform_2(%arg0: i32, %arg1: i32, %arg2: i32) -> (i32, i32, i32) {
    %c0_i32 = arith.constant 0 : i32
    %c0_i32_0 = arith.constant 0 : i32
    return %arg0, %arg2, %c0_i32 : i32, i32, i32
  }
  func.func @transform_3(%arg0: i32, %arg1: i32, %arg2: i32) -> (i32, i32, i32) {
    %c0_i32 = arith.constant 0 : i32
    %c0_i32_0 = arith.constant 0 : i32
    return %arg0, %arg1, %c0_i32 : i32, i32, i32
  }
  func.func @transform_4(%arg0: i32, %arg1: i32, %arg2: i32) -> (i32, i32) {
    %c0_i32 = arith.constant 0 : i32
    %c0_i32_0 = arith.constant 0 : i32
    %c0_i32_1 = arith.constant 0 : i32
    return %c0_i32, %c0_i32_0 : i32, i32
  }
  func.func @transform_5(%arg0: i32, %arg1: i32, %arg2: i32) -> (i32, i32) {
    %c0_i32 = arith.constant 0 : i32
    %c0_i32_0 = arith.constant 0 : i32
    %c0_i32_1 = arith.constant 0 : i32
    return %c0_i32, %c0_i32_0 : i32, i32
  }
  func.func @transform_6(%arg0: i32, %arg1: i32, %arg2: i32) -> (i32, i32) {
    %c0_i32 = arith.constant 0 : i32
    %c0_i32_0 = arith.constant 0 : i32
    %c0_i32_1 = arith.constant 0 : i32
    return %c0_i32, %c0_i32_0 : i32, i32
  }
  func.func @transform_7(%arg0: i32, %arg1: i32, %arg2: i32) -> (i32, i32) {
    %c0_i32 = arith.constant 0 : i32
    %c0_i32_0 = arith.constant 0 : i32
    %c0_i32_1 = arith.constant 0 : i32
    return %c0_i32, %c0_i32_0 : i32, i32
  }
  func.func @transform_8(%arg0: i32, %arg1: i32, %arg2: i32) -> (i32, i32) {
    %c0_i32 = arith.constant 0 : i32
    %c0_i32_0 = arith.constant 0 : i32
    %c0_i32_1 = arith.constant 0 : i32
    return %c0_i32, %c0_i32_0 : i32, i32
  }
  func.func @transform_9(%arg0: i32, %arg1: i32, %arg2: i32) -> (i32, i32) {
    %c0_i32 = arith.constant 0 : i32
    %c0_i32_0 = arith.constant 0 : i32
    %c0_i32_1 = arith.constant 0 : i32
    return %c0_i32, %c0_i32_0 : i32, i32
  }
  func.func @transform_10(%arg0: i32, %arg1: i32, %arg2: i32) -> (i32, i32) {
    %c0_i32 = arith.constant 0 : i32
    %c0_i32_0 = arith.constant 0 : i32
    %c0_i32_1 = arith.constant 0 : i32
    return %c0_i32, %c0_i32_0 : i32, i32
  }
  func.func @transform_11(%arg0: i32, %arg1: i32, %arg2: i32) -> (i32, i32) {
    %c0_i32 = arith.constant 0 : i32
    %c0_i32_0 = arith.constant 0 : i32
    %c0_i32_1 = arith.constant 0 : i32
    return %c0_i32, %c0_i32_0 : i32, i32
  }
  func.func @transform_12(%arg0: i32, %arg1: i32, %arg2: i32) -> (i32, i32) {
    %c0_i32 = arith.constant 0 : i32
    %c0_i32_0 = arith.constant 0 : i32
    %c0_i32_1 = arith.constant 0 : i32
    return %c0_i32, %c0_i32_0 : i32, i32
  }
  func.func @transform_13(%arg0: i32, %arg1: i32, %arg2: i32) -> (i32, i32) {
    %c0_i32 = arith.constant 0 : i32
    %c0_i32_0 = arith.constant 0 : i32
    %c0_i32_1 = arith.constant 0 : i32
    return %c0_i32, %c0_i32_0 : i32, i32
  }
  func.func @transform_14(%arg0: i32, %arg1: i32, %arg2: i32) -> (i32, i32) {
    %c0_i32 = arith.constant 0 : i32
    %c0_i32_0 = arith.constant 0 : i32
    %c0_i32_1 = arith.constant 0 : i32
    return %c0_i32, %c0_i32_0 : i32, i32
  }
  func.func @transform_15(%arg0: i32, %arg1: i32, %arg2: i32) -> (i32, i32) {
    %c0_i32 = arith.constant 0 : i32
    %c0_i32_0 = arith.constant 0 : i32
    %c0_i32_1 = arith.constant 0 : i32
    return %c0_i32, %c0_i32_0 : i32, i32
  }
  func.func @transform_16(%arg0: i32, %arg1: i32, %arg2: i32) -> (i32, i32) {
    %c0_i32 = arith.constant 0 : i32
    %c0_i32_0 = arith.constant 0 : i32
    %c0_i32_1 = arith.constant 0 : i32
    return %c0_i32, %c0_i32_0 : i32, i32
  }
  func.func @transform_17(%arg0: i32, %arg1: i32, %arg2: i32) -> (i32, i32) {
    %c0_i32 = arith.constant 0 : i32
    %c0_i32_0 = arith.constant 0 : i32
    %c0_i32_1 = arith.constant 0 : i32
    return %c0_i32, %c0_i32_0 : i32, i32
  }
  func.func @transform_18(%arg0: i32, %arg1: i32, %arg2: i32) -> (i32, i32) {
    %c0_i32 = arith.constant 0 : i32
    %c0_i32_0 = arith.constant 0 : i32
    %c0_i32_1 = arith.constant 0 : i32
    return %c0_i32, %c0_i32_0 : i32, i32
  }
  func.func @transform_19(%arg0: i32, %arg1: i32, %arg2: i32) -> (i32, i32) {
    %c0_i32 = arith.constant 0 : i32
    %c0_i32_0 = arith.constant 0 : i32
    %c0_i32_1 = arith.constant 0 : i32
    return %c0_i32, %c0_i32_0 : i32, i32
  }
  func.func @transform_20(%arg0: i32, %arg1: i32, %arg2: i32) -> (i32, i32, i32) {
    %c0_i32 = arith.constant 0 : i32
    %c0_i32_0 = arith.constant 0 : i32
    return %arg0, %arg1, %c0_i32 : i32, i32, i32
  }
}

</mosaic_0001>

<bundles_post_ra>
// kernel: tpu_custom_call.1
= control target key start
LH: loop header
LB: loop body
LE: loop exit
PB: predicated region body
PF: predicated region fallthrough
CT: control target
= control target key end

     0   :  { %s2090_s0 = inlined_call_operand.vmem [shape: f32[2,8,32], index: 0, kind: input, shape index: {}]   ;;  %s2091_s1 = inlined_call_operand.vmem [shape: f32[2,8,32], index: 1, kind: input, shape index: {}]   ;;  %s2092_s2 = inlined_call_operand.vmem [shape: f32[2,8,32], index: 2, kind: input, shape index: {}]   ;;  %s2093_s3 = inlined_call_operand.vmem [shape: f32[2,8,32], index: 3, kind: input, shape index: {}]   ;;  %s2094_s4 = inlined_call_operand.vmem [shape: f32[8,8], index: 4, kind: input, shape index: {}]   ;;  %s2095_s5 = inlined_call_operand.vmem [shape: f32[1,8], index: 5, kind: input, shape index: {}]   ;;  %s2096_s6 = inlined_call_operand.vmem [shape: f32[8,8], index: 6, kind: input, shape index: {}]   ;;  %s2097_s7 = inlined_call_operand.vmem [shape: f32[1,8], index: 7, kind: input, shape index: {}]   ;;  %s2098_s8 = inlined_call_operand.vmem [shape: f32[8,8], index: 8, kind: input, shape index: {}]   ;;  %s2099_s9 = inlined_call_operand.vmem [shape: f32[1,8], index: 9, kind: input, shape index: {}]   ;;  %s2100_s10 = inlined_call_operand.vmem [shape: f32[32,32], index: 10, kind: input, shape index: {}]   ;;  %s2101_s11 = inlined_call_operand.vmem [shape: f32[1,32], index: 11, kind: input, shape index: {}]   ;;  %s2102_s12 = inlined_call_operand.vmem [shape: f32[1,32], index: 12, kind: input, shape index: {}]   ;;  %s2103_s13 = inlined_call_operand.vmem [shape: f32[1,32], index: 13, kind: input, shape index: {}]   ;;  %s2104_s14 = inlined_call_operand.vmem [shape: f32[32,128], index: 14, kind: input, shape index: {}]   ;;  %s2105_s15 = inlined_call_operand.vmem [shape: f32[1,128], index: 15, kind: input, shape index: {}]   ;;  %s2106_s16 = inlined_call_operand.vmem [shape: f32[128,32], index: 16, kind: input, shape index: {}]   ;;  %s2107_s17 = inlined_call_operand.vmem [shape: f32[1,32], index: 17, kind: input, shape index: {}]   ;;  %s2108_s18 = inlined_call_operand.vmem [shape: f32[1,32], index: 18, kind: input, shape index: {}]   ;;  %s2109_s19 = inlined_call_operand.vmem [shape: f32[1,32], index: 19, kind: input, shape index: {}]   ;;  %s2110_s20 = inlined_call_operand.hbm [shape: f32[2,8,32], index: 20, kind: output, shape index: {}]  }
   0x1   :  { %2120 = sst [smem:[#allocation15_spill]] %s2090_s0 }
   0x2   :  { %2121 = sst [smem:[#allocation16_spill]] %s2091_s1 }
   0x3   :  { %2122 = sst [smem:[#allocation17_spill]] %s2092_s2 }
   0x4   :  { %2123 = sst [smem:[#allocation18_spill]] %s2093_s3 }
   0x5   :  { %2124 = sst [smem:[#allocation19_spill]] %s2094_s4 }
   0x6   :  { %2125 = sst [smem:[#allocation20_spill]] %s2109_s19 }
   0x7   :  { %25 = vsyncpa [#allocation5], 0 }
   0x8   :  { %27 = vsyncpa [#allocation5 + $0x1], 0  ;;  %s1809_s1 = smov 0   ;;  %s1811_s22 = smov 0  }
   0x9   :  { %s1813_s23 = smov 0   ;;  %s1815_s24 = smov 0  }
   0xa   :  { %s1817_s2 = smov 0   ;;  %s1819_s25 = smov 0  }
   0xb LB: > { %2126 = sst [smem:[#allocation7_spill]] %s1674_s1  ;;  %s1487_s3 = sadd.s32 4294967295, %s1694_s25   ;;  %s1694_s25 = sphi %s1819_s25, %s33_s25   ;;  %s1690_s2 = sphi %s1817_s2, %s2149_s2   ;;  %s1686_s24 = sphi %s1815_s24, %s2148_s24   ;;  %s1682_s23 = sphi %s1813_s23, %s2147_s23   ;;  %s1678_s22 = sphi %s1811_s22, %s2151_s22   ;;  %s1674_s1 = sphi %s1809_s1, %s2150_s1  }
   0xc   : > { %2127 = sst [smem:[#allocation8_spill]] %s1682_s23  ;;  %s1488_s26 = sadd.s32 4294967294, %s1694_s25  }
   0xd   : > { %2128 = sst [smem:[#allocation9_spill]] %s1690_s2  ;;  %s52_s27 = sadd.s32 1, %s1690_s2 }
   0xe   : > { %2129 = sst [smem:[#allocation10_spill]] %s1694_s25  ;;  %s509_s28 = sadd.s32 1, %s1682_s23 }
   0xf   : > { %p54_p0 = scmp.ge.s32.totalorder %s52_s27, 2  ;;  %p519_p1 = scmp.ne.s32.totalorder %s1682_s23, %s1678_s22 }
  0x10   : > { %p520_p2 = scmp.eq.s32.totalorder %s1487_s3, 1  ;;  %p525_p3 = scmp.ne.s32.totalorder %s1678_s22, %s1674_s1 }
  0x11   : > { %s2153_s27 = smov (%p54_p0, %s52_s27), 0  ;;  %p526_p5 = scmp.eq.s32.totalorder %s1488_s26, 1 }
  0x12   : > { %2130 = sst [smem:[#allocation11_spill]] %s2153_s27  ;;  %p1849_p4 = por %p520_p2, %p519_p1 }
  0x13   : > { %s504_s29 = ssub.s32 %s1690_s2, %s2153_s27  ;;  %p1491_p6 = scmp.ge.s32.totalorder %s1694_s25, 1 }
  0x14   : > { %s2131_s4 = scalar_select %p1849_p4, 1, 0 }
  0x15   : > { %p507_p7 = scmp.eq.s32.totalorder %s504_s29, 0  ;;  %p1856_p8 = por %p526_p5, %p525_p3 }
  0x16   : > { %2132 = sst [smem:[#allocation12_spill]] %s2131_s4  ;;  %p632_p9 = scmp.lt.s32.totalorder %s1694_s25, 3 }
  0x17   : > { %s2133_s30 = scalar_select %p1856_p8, 1, 0 }
  0x18   : > { %s1862_s0 = scalar_select %p507_p7, %s1682_s23, %s509_s28  }
  0x19   : > { %2134 = sst [smem:[#allocation13_spill]] %s2133_s30  ;;  %p633_p10 = pnand %p1491_p6, %p632_p9 }
  0x1a   : > { %2135 = sst [smem:[#allocation14_spill]] %s1862_s0  ;;  %p713_p11 = scmp.lt.s32.totalorder (!%p633_p10), %s1686_s24, 1 }
  0x1b   : > { %636 = sbr.rel (%p633_p10) target bundleno = 1667 (0x683), region = 100  ;;  %s2136_s1 = sld [smem:[#allocation19_spill]] (!%p633_p10) }
  0x1c   : > { %s2137_s23 = sld [smem:[#allocation15_spill]] (!%p633_p10)  ;;  %s1696_s27 = smov (!%p633_p10), 120  }
  0x1d   : > { %s2138_s4 = sld [smem:[#allocation16_spill]] (!%p633_p10)  ;;  %s1697_s21 = smov (!%p633_p10), 112  }
  0x1e   : > { %s1698_s3 = smov (!%p633_p10), 104   ;;  %s2139_s25 = sld [smem:[#allocation17_spill]] (!%p633_p10) }
  0x1f   : > { %s1702_s19 = smov (!%p633_p10), 24   ;;  %s710_s28 = sand.u32 (!%p633_p10), 1, %s1678_s22  }
  0x20   : > { %v812_v1 = vld [vmem:[%s2096_s6] sm:$0xff]  ;;  %s714_s29 = scalar_select %p713_p11, %s1686_s24, 1  ;;  %vm745_vm0 = vcmask 64512   ;;  %vm1168_vm1 = vcmask 130048   ;;  %vm1170_vm2 = vcmask 195584   ;;  %vm1180_vm3 = vcmask 261120  }
  0x21   : > { %v758_v0 = vld [vmem:[%s2136_s1] sm:$0xff]  ;;  %841 = vmatpush.msra.mxu1 %v812_v1  ;;  %v1699_v1 = vmov 0.0   ;;  %s2142_s0 = sld [smem:[#allocation20_spill]] }
  0x22   : > { %786 = vmatpush.msra.mxu0 %v758_v0  ;;  %s1872_s2 = sshll.u32 %s714_s29, 3  ;;  %v1590_v8 = vld [vmem:[%s2095_s5] ss:$0 sm:$0xff]  ;;  %746 = vst.msk [vmem:[#allocation2] sm:$0xff] %vm745_vm0, %v1699_v1 }
  0x23   : > { %s719_s30 = scalar_lea.vmem %s2137_s23, %s1872_s2  ;;  %s726_s1 = scalar_lea.vmem %s2138_s4, %s1872_s2  ;;  %v1591_v14 = vld [vmem:[%s2097_s7] ss:$0 sm:$0xff]  ;;  %747 = vst.msk [vmem:[#allocation2 + $0x8] sm:$0xff] %vm745_vm0, %v1699_v1 }
  0x24   : > { %v750_v2 = vld [vmem:[%s719_s30] sm:$0xff]  ;;  %s733_s4 = scalar_lea.vmem %s2139_s25, %s1872_s2  ;;  %748 = vst.msk [vmem:[#allocation2 + $0x10] sm:$0xff] %vm745_vm0, %v1699_v1  ;;  %s1701_s23 = smov 16  }
  0x25   : > { %752 = vrot.lane.b32.xlu0 %v750_v2, %s1696_s27  ;;  %754 = vrot.lane.b32.xlu1 %v750_v2, %s1697_s21  ;;  %v804_v3 = vld [vmem:[%s726_s1] sm:$0xff]  ;;  %749 = vst.msk [vmem:[#allocation2 + $0x18] sm:$0xff] %vm745_vm0, %v1699_v1  ;;  %s1492_s1 = sshll.u32 %s710_s28, 3 }
  0x26   : > { %756 = vrot.lane.b32.xlu2 %v750_v2, %s1698_s3  ;;  %1497 = vmatmul.msk.f32.vlgmr.msra.gmra.mxu0 %vm745_vm0, %v750_v2  ;;  %v855_v4 = vld [vmem:[%s733_s4] sm:$0xff]  ;;  %s712_s26 = scalar_lea.vmem [#allocation4], %s1492_s1  ;;  %s1636_s1 = scalar_lea.hbm %s2110_s20, 16 }
  0x27   : > { %1501 = vmatmul.msk.f32.vlgmr.msra.gmra.mxu1 %vm745_vm0, %v804_v3  ;;  %v863_v18 = vld [vmem:[%s2098_s8] sm:$0xff] }
  0x28   : > { %891 = vmatpush.msra.mxu2 %v863_v18  ;;  %v1592_v37 = vld [vmem:[%s2099_s9] ss:$0 sm:$0xff] }
  0x29   : > { %1505 = vmatmul.msk.f32.vlgmr.msra.gmra.mxu2 %vm745_vm0, %v855_v4  ;;  %v1044_v18 = vld [vmem:[#allocation2] sm:$0xff] }
  0x2a   : > { %v1245_v1 = vld [vmem:[%s2104_s14] sm:$0xff] }
  0x2d   : > { %806 = vrot.lane.b32.xlu0 %v804_v3, %s1696_s27  ;;  %808 = vrot.lane.b32.xlu1 %v804_v3, %s1697_s21 }
  0x2e   : > { %810 = vrot.lane.b32.xlu2 %v804_v3, %s1698_s3 }
  0x35   : > { %857 = vrot.lane.b32.xlu0 %v855_v4, %s1696_s27  ;;  %859 = vrot.lane.b32.xlu1 %v855_v4, %s1697_s21  ;;  %s1524_s27 = sshll.u32 %s1686_s24, 3  ;;  %s1365_s24 = sshll.u32 %s712_s26, 4  ;;  %s1366_s24 = int_to_ptr.vmem [resolvable:$true] %s1365_s24 }
  0x36   : > { %861 = vrot.lane.b32.xlu2 %v855_v4, %s1698_s3  ;;  %s1700_s3 = smov 8   ;;  %s1352_s21 = scalar_lea.sflag [#allocation5], %s710_s28 }
  0x80   : > { %v757_v9 = vpop.permute.xlu2 %756 }
  0x88   : > { %v811_v13 = vpop.permute.xlu2 %810 }
  0x90   : > { %v862_v32 = vpop.permute.xlu2 %861 }
  0x97   : > { %v753_v5 = vpop.permute.xlu0 %752  ;;  %v755_v6 = vpop.permute.xlu1 %754 }
  0x98   : > { %1498 = vmatmul.msk.f32.gmra.mxu0 %vm745_vm0, %v753_v5 }
  0x9f   : > { %v807_v7 = vpop.permute.xlu0 %806  ;;  %v809_v12 = vpop.permute.xlu1 %808 }
  0xa0   : > { %1499 = vmatmul.msk.f32.gmra.mxu0 %vm745_vm0, %v755_v6  ;;  %1502 = vmatmul.msk.f32.gmra.mxu1 %vm745_vm0, %v807_v7 }
  0xa3   : > { %v788_v10 = vpop.f32.mrf.mxu0 }
  0xa4   : > { %v789_v11 = vadd.f32 %v1590_v8, %v788_v10  ;;  %v843_v15 = vpop.f32.mrf.mxu1 }
  0xa5   : > { %v844_v16 = vadd.f32 %v1591_v14, %v843_v15 }
  0xa6   : > { %800 = vst.msk [vmem:[#allocation3] sm:$0xff] %vm745_vm0, %v789_v11 }
  0xa7   : > { %1509 = vmatpush.xpose.msk.msra.mxu3 %vm745_vm0, %v844_v16  ;;  %v858_v21 = vpop.permute.xlu0 %857  ;;  %v860_v26 = vpop.permute.xlu1 %859 }
  0xa8   : > { %1500 = vmatmul.msk.f32.gmra.mxu0 %vm745_vm0, %v757_v9  ;;  %1503 = vmatmul.msk.f32.gmra.mxu1 %vm745_vm0, %v809_v12 }
  0xa9   : > { %1506 = vmatmul.msk.f32.gmra.mxu2 %vm745_vm0, %v858_v21 }
  0xac   : > { %v893_v38 = vpop.f32.mrf.mxu2 }
  0xad   : > { %v905_v17 = vld [vmem:[#allocation3] sm:$0xff]  ;;  %v894_v39 = vadd.f32 %v1592_v37, %v893_v38 }
  0xae   : > { %1510 = vmatmul.msk.f32.vlgmr.msra.gmra.mxu3 %vm745_vm0, %v905_v17 }
  0xaf   : > { %1066 = vmatpush.msrb.mxu0 %v894_v39 }
  0xb0   : > { %1504 = vmatmul.msk.f32.gmra.mxu1 %vm745_vm0, %v811_v13 }
  0xb1   : > { %1507 = vmatmul.msk.f32.gmra.mxu2 %vm745_vm0, %v860_v26 }
  0xb9   : > { %1508 = vmatmul.msk.f32.gmra.mxu2 %vm745_vm0, %v862_v32 }
 0x115   : > { %v791_v19 = vpop.f32.mrf.mxu0 }
 0x116   : > { %v792_v20 = vadd.f32 %v1590_v8, %v791_v19  ;;  %v1045_v19 = vld [vmem:[#allocation2 + $0x8] sm:$0xff] }
 0x118   : > { %801 = vst.msk [vmem:[#allocation3 + $0x8] sm:$0xff] %vm745_vm0, %v792_v20 }
 0x11d   : > { %v794_v22 = vpop.f32.mrf.mxu0  ;;  %v846_v23 = vpop.f32.mrf.mxu1 }
 0x11e   : > { %v795_v24 = vadd.f32 %v1590_v8, %v794_v22  ;;  %v847_v25 = vadd.f32 %v1591_v14, %v846_v23 }
 0x11f   : > { %v906_v27 = vld [vmem:[#allocation3 + $0x8] sm:$0xff] }
 0x120   : > { %802 = vst.msk [vmem:[#allocation3 + $0x10] sm:$0xff] %vm745_vm0, %v795_v24  ;;  %1511 = vmatpush.xpose.msk.msrb.mxu3 %vm745_vm0, %v847_v25  ;;  %v1046_v24 = vld [vmem:[#allocation2 + $0x10] sm:$0xff] }
 0x123   : > { %1512 = vmatmul.msk.f32.vlgmr.msrb.gmra.mxu3 %vm745_vm0, %v906_v27 }
 0x125   : > { %v797_v28 = vpop.f32.mrf.mxu0  ;;  %v849_v29 = vpop.f32.mrf.mxu1 }
 0x126   : > { %v798_v30 = vadd.f32 %v1590_v8, %v797_v28  ;;  %v850_v31 = vadd.f32 %v1591_v14, %v849_v29  ;;  %v1047_v28 = vld [vmem:[#allocation2 + $0x18] sm:$0xff] }
 0x127   : > { %v907_v33 = vld [vmem:[#allocation3 + $0x10] sm:$0xff] }
 0x128   : > { %803 = vst.msk [vmem:[#allocation3 + $0x18] sm:$0xff] %vm745_vm0, %v798_v30  ;;  %1513 = vmatpush.xpose.msk.msra.mxu3 %vm745_vm0, %v850_v31 }
 0x12b   : > { %1514 = vmatmul.msk.f32.vlgmr.msra.gmra.mxu3 %vm745_vm0, %v907_v33  ;;  %v1175_v33 = vld [vmem:[%s2100_s10 + $0x18] sm:$0xff] }
 0x12c   : > { %v896_v43 = vpop.f32.mrf.mxu2  ;;  %1196 = vmatpush.msra.mxu0 %v1175_v33  ;;  %v1596_v33 = vld [vmem:[%s2105_s15] ss:$0 sm:$0xff] }
 0x12d   : > { %v852_v34 = vpop.f32.mrf.mxu1  ;;  %v897_v44 = vadd.f32 %v1592_v37, %v896_v43 }
 0x12e   : > { %v853_v35 = vadd.f32 %v1591_v14, %v852_v34  ;;  %v1174_v34 = vld [vmem:[%s2100_s10 + $0x10] sm:$0xff] }
 0x12f   : > { %v908_v36 = vld [vmem:[#allocation3 + $0x18] sm:$0xff]  ;;  %1089 = vmatpush.msrb.mxu1 %v897_v44  ;;  %1197 = vmatpush.msra.mxu0 %v1174_v34  ;;  %v1593_v44 = vld [vmem:[%s2101_s11] ss:$0 sm:$0xff] }
 0x130   : > { %1515 = vmatpush.xpose.msk.msrb.mxu3 %vm745_vm0, %v853_v35  ;;  %v1173_v35 = vld [vmem:[%s2100_s10 + $0x8] sm:$0xff] }
 0x131   : > { %v932_v40 = vpop.f32.mrf.mxu3  ;;  %1198 = vmatpush.msra.mxu0 %v1173_v35 }
 0x132   : > { %v1013_v48 = vsel %vm745_vm0, %v932_v40, -inf }
 0x133   : > { %1516 = vmatmul.msk.f32.vlgmr.msrb.gmra.mxu3 %vm745_vm0, %v908_v36  ;;  %v1172_v36 = vld [vmem:[%s2100_s10] sm:$0xff] }
 0x134   : > { %v899_v47 = vpop.f32.mrf.mxu2  ;;  %1199 = vmatpush.msra.mxu0 %v1172_v36 }
 0x135   : > { %v900_v51 = vadd.f32 %v1592_v37, %v899_v47 }
 0x137   : > { %1112 = vmatpush.msra.mxu3 %v900_v51 }
 0x13c   : > { %v902_v62 = vpop.f32.mrf.mxu2 }
 0x13d   : > { %v903_v0 = vadd.f32 %v1592_v37, %v902_v62  ;;  %v1248_v62 = vld [vmem:[%s2104_s14 + $0x18] sm:$0xff] }
 0x13e   : > { %1268 = vmatpush.msra.mxu1 %v1248_v62 }
 0x13f   : > { %1135 = vmatpush.msrb.mxu3 %v903_v0  ;;  %v1246_v0 = vld [vmem:[%s2104_s14 + $0x8] sm:$0xff] }
 0x1a6   : > { %v958_v41 = vpop.f32.mrf.mxu3 }
 0x1a7   : > { %v1014_v45 = vsel %vm745_vm0, %v958_v41, -inf }
 0x1a8   : > { %v1017_v52 = vmax.f32 %v1013_v48, %v1014_v45 }
 0x1ae   : > { %v984_v42 = vpop.f32.mrf.mxu3 }
 0x1af   : > { %v1015_v49 = vsel %vm745_vm0, %v984_v42, -inf }
 0x1b6   : > { %v1010_v46 = vpop.f32.mrf.mxu3 }
 0x1b7   : > { %v1016_v50 = vsel %vm745_vm0, %v1010_v46, -inf }
 0x1b8   : > { %v1018_v53 = vmax.f32 %v1015_v49, %v1016_v50  ;;  %v1703_v50 = vmov 32.0  }
 0x1ba   : > { %v1019_v54 = vmax.f32 %v1017_v52, %v1018_v53 }
 0x1bc   : > { %v1020_v55 = vsub.f32 %v932_v40, %v1019_v54  ;;  %v1021_v56 = vsub.f32 %v958_v41, %v1019_v54  ;;  %v1022_v57 = vsub.f32 %v984_v42, %v1019_v54  ;;  %v1023_v58 = vsub.f32 %v1010_v46, %v1019_v54 }
 0x1be   : > { %v1024_v59 = vmul.f32 1.442695, %v1020_v55  ;;  %v1026_v60 = vmul.f32 1.442695, %v1021_v56  ;;  %v1028_v61 = vmul.f32 1.442695, %v1022_v57 }
 0x1bf   : > { %v1030_v63 = vmul.f32 1.442695, %v1023_v58 }
 0x1c0   : > { %1600 = vpow2.f32 %v1024_v59 }
 0x1c1   : > { %1602 = vpow2.f32 %v1026_v60 }
 0x1c2   : > { %1604 = vpow2.f32 %v1028_v61 }
 0x1c3   : > { %1606 = vpow2.f32 %v1030_v63  ;;  %v1247_v63 = vld [vmem:[%s2104_s14 + $0x10] sm:$0xff] }
 0x1c4   : > { %1269 = vmatpush.msra.mxu1 %v1247_v63 }
 0x1c6   : > { %v1601_v2 = vpop.eup %1600  ;;  %1270 = vmatpush.msra.mxu1 %v1246_v0 }
 0x1c7   : > { %v1603_v3 = vpop.eup %1602  ;;  %v1032_v4 = vsel %vm745_vm0, %v1601_v2, 0.0 }
 0x1c8   : > { %v1605_v5 = vpop.eup %1604  ;;  %v1033_v6 = vsel %vm745_vm0, %v1603_v3, 0.0  ;;  %1271 = vmatpush.msra.mxu1 %v1245_v1 }
 0x1c9   : > { %v1607_v7 = vpop.eup %1606  ;;  %v1034_v8 = vadd.f32 %v1033_v6, %v1032_v4  ;;  %v1035_v9 = vsel %vm745_vm0, %v1605_v5, 0.0  ;;  %v1290_v4 = vld [vmem:[%s2106_s16 + $0x68] sm:$0xff] }
 0x1ca   : > { %v1037_v11 = vsel %vm745_vm0, %v1607_v7, 0.0 }
 0x1cb   : > { %v1036_v10 = vadd.f32 %v1035_v9, %v1034_v8  ;;  %v1288_v9 = vld [vmem:[%s2106_s16 + $0x58] sm:$0xff] }
 0x1cd   : > { %v1038_v12 = vadd.f32 %v1037_v11, %v1036_v10  ;;  %v1287_v10 = vld [vmem:[%s2106_s16 + $0x50] sm:$0xff]  ;;  %v1286_v11 = vld [vmem:[%s2106_s16 + $0x48] sm:$0xff] }
 0x1cf   : > { %1608 = vrcp.f32 %v1038_v12  ;;  %v1285_v12 = vld [vmem:[%s2106_s16 + $0x40] sm:$0xff] }
 0x1d0   : > { %1610 = vrcp.f32 %v1703_v50 }
 0x1d5   : > { %v1609_v13 = vpop.eup %1608 }
 0x1d6   : > { %v1040_v14 = vmul.f32 %v1609_v13, %v1601_v2  ;;  %v1041_v15 = vmul.f32 %v1609_v13, %v1603_v3  ;;  %v1042_v16 = vmul.f32 %v1609_v13, %v1605_v5  ;;  %v1043_v17 = vmul.f32 %v1609_v13, %v1607_v7  ;;  %v1611_v51 = vpop.eup %1610  ;;  %v1292_v2 = vld [vmem:[%s2106_s16 + $0x78] sm:$0xff]  ;;  %v1291_v3 = vld [vmem:[%s2106_s16 + $0x70] sm:$0xff]  ;;  %v1289_v7 = vld [vmem:[%s2106_s16 + $0x60] sm:$0xff] }
 0x1d7   : > { %v1212_v52 = vmul.f32 32.0, %v1611_v51  ;;  %vm1216_vm4 = vweird.f32 %v1611_v51  ;;  %1297 = vmatpush.msrb.mxu2 %v1292_v2 }
 0x1d8   : > { %1517 = vmatmul.msk.f32.vlgmr.msrb.gmra.mxu0 %vm745_vm0, %v1040_v14  ;;  %1518 = vmatmul.msk.f32.vlgmr.msrb.gmra.mxu1 %vm745_vm0, %v1041_v15  ;;  %v1284_v14 = vld [vmem:[%s2106_s16 + $0x38] sm:$0xff] }
 0x1d9   : > { %1519 = vmatmul.msk.f32.vlgmr.msra.gmra.mxu3 %vm745_vm0, %v1042_v16  ;;  %v1213_v53 = vsub.f32 1.0, %v1212_v52  ;;  %1298 = vmatpush.msrb.mxu2 %v1291_v3  ;;  %v1283_v16 = vld [vmem:[%s2106_s16 + $0x30] sm:$0xff] }
 0x1db   : > { %v1214_v54 = vmul.f32 %v1611_v51, %v1213_v53  ;;  %1299 = vmatpush.msrb.mxu2 %v1290_v4 }
 0x1dd   : > { %v1215_v55 = vadd.f32 %v1611_v51, %v1214_v54  ;;  %1300 = vmatpush.msrb.mxu2 %v1289_v7 }
 0x1df   : > { %v1964_v56 = vsel %vm1216_vm4, %v1611_v51, %v1215_v55  ;;  %1301 = vmatpush.msrb.mxu2 %v1288_v9 }
 0x1e1   : > { %1520 = vmatmul.msk.f32.vlgmr.msrb.gmra.mxu3 %vm745_vm0, %v1043_v17  ;;  %1302 = vmatpush.msrb.mxu2 %v1287_v10 }
 0x1e3   : > { %1303 = vmatpush.msrb.mxu2 %v1286_v11 }
 0x1e5   : > { %1304 = vmatpush.msrb.mxu2 %v1285_v12 }
 0x1e7   : > { %1305 = vmatpush.msrb.mxu2 %v1284_v14 }
 0x1e9   : > { %1306 = vmatpush.msrb.mxu2 %v1283_v16 }
 0x255   : > { %v1068_v20 = vpop.f32.mrf.mxu0  ;;  %v1091_v21 = vpop.f32.mrf.mxu1 }
 0x256   : > { %v1140_v22 = vadd.f32 %v1068_v20, %v1044_v18  ;;  %v1141_v23 = vadd.f32 %v1091_v21, %v1045_v19  ;;  %v1282_v18 = vld [vmem:[%s2106_s16 + $0x28] sm:$0xff]  ;;  %v1281_v20 = vld [vmem:[%s2106_s16 + $0x20] sm:$0xff] }
 0x257   : > { %1307 = vmatpush.msrb.mxu2 %v1282_v18 }
 0x258   : > { %1144 = vst.msk [vmem:[#allocation2] sm:$0xff] %vm745_vm0, %v1140_v22  ;;  %v1280_v22 = vld [vmem:[%s2106_s16 + $0x18] sm:$0xff] }
 0x259   : > { %1145 = vst.msk [vmem:[#allocation2 + $0x8] sm:$0xff] %vm745_vm0, %v1141_v23  ;;  %1308 = vmatpush.msrb.mxu2 %v1281_v20 }
 0x25b   : > { %1309 = vmatpush.msrb.mxu2 %v1280_v22 }
 0x25c   : > { %v1114_v25 = vpop.f32.mrf.mxu3 }
 0x25d   : > { %v1142_v26 = vadd.f32 %v1114_v25, %v1046_v24  ;;  %v1594_v24 = vld [vmem:[%s2102_s12] ss:$0 sm:$0xff] }
 0x25f   : > { %1146 = vst.msk [vmem:[#allocation2 + $0x10] sm:$0xff] %vm745_vm0, %v1142_v26  ;;  %v1151_v38 = vld [vmem:[#allocation2] sm:$0xff] }
 0x260   : > { %v1152_v27 = vld [vmem:[#allocation2 + $0x8] sm:$0xff] }
 0x261   : > { %1156 = vrot.lane.b32.xlu0 %v1152_v27, %s1700_s3  ;;  %v1595_v27 = vld [vmem:[%s2103_s13] ss:$0 sm:$0xff] }
 0x264   : > { %v1137_v29 = vpop.f32.mrf.mxu3 }
 0x265   : > { %v1143_v30 = vadd.f32 %v1137_v29, %v1047_v28 }
 0x266   : > { %v1153_v31 = vld [vmem:[#allocation2 + $0x10] sm:$0xff] }
 0x267   : > { %1147 = vst.msk [vmem:[#allocation2 + $0x18] sm:$0xff] %vm745_vm0, %v1143_v30  ;;  %1160 = vrot.lane.b32.xlu1 %v1153_v31, %s1701_s23  ;;  %v1279_v30 = vld [vmem:[%s2106_s16 + $0x10] sm:$0xff]  ;;  %v1278_v31 = vld [vmem:[%s2106_s16 + $0x8] sm:$0xff] }
 0x268   : > { %1310 = vmatpush.msrb.mxu2 %v1279_v30 }
 0x26a   : > { %1311 = vmatpush.msrb.mxu2 %v1278_v31 }
 0x26e   : > { %v1154_v32 = vld [vmem:[#allocation2 + $0x18] sm:$0xff] }
 0x26f   : > { %1164 = vrot.lane.b32.xlu2 %v1154_v32, %s1702_s19  ;;  %s2140_s19 = sld [smem:[#allocation18_spill]]  ;;  %v1277_v32 = vld [vmem:[%s2106_s16] sm:$0xff] }
 0x270   : > { %1312 = vmatpush.msrb.mxu2 %v1277_v32 }
 0x275   : > { %s740_s25 = scalar_lea.vmem %s2140_s19, %s1872_s2 }
 0x276   : > { %v1204_v46 = vld [vmem:[%s740_s25] sm:$0xff]  ;;  %s1363_s25 = scalar_lea.hbm %s2110_s20, %s1524_s27 }
 0x277   : > { %s1367_s29 = sshll.u32 %s1363_s25, 4  ;;  %s1368_s29 = int_to_ptr.hbm [resolvable:$true] %s1367_s29 }
 0x278   : > { %s1630_s3 = sshra.s32 %s1368_s29, 4  ;;  %s1631_s3 = int_to_ptr.hbm [resolvable:$true] %s1630_s3 }
 0x279   : > { %s1632_s27 = scalar_lea.hbm %s1631_s3, 8  ;;  %p1637_p1 = scmp.lt.s32.totalorder %s1631_s3, %s2110_s20 }
 0x27a   : > { %p1633_p12 = scmp.ne.s32.totalorder %s1631_s3, %s1632_s27  ;;  %p1638_p2 = scmp.lt.s32.totalorder %s1636_s1, %s1632_s27 }
 0x27c   : > { %p1634_p13 = pnand %p1633_p12, %p1849_p4  ;;  %p1639_p3 = por %p1638_p2, %p1637_p1 }
 0x27e   : > { %p1635_p0 = pneg %p1634_p13 }
 0x280   : > { %p1640_p5 = pnand %p1639_p3, %p1635_p0 }
 0x2c9   : > { %v1165_v41 = vpop.permute.xlu2 %1164 }
 0x2d3   : > { %v1157_v37 = vpop.permute.xlu0 %1156 }
 0x2d4   : > { %v1167_v39 = vsel %vm745_vm0, %v1151_v38, %v1157_v37  ;;  %v1597_v37 = vld [vmem:[%s2107_s17] ss:$0 sm:$0xff] }
 0x2d9   : > { %v1161_v40 = vpop.permute.xlu1 %1160 }
 0x2da   : > { %v1169_v42 = vsel %vm1168_vm1, %v1167_v39, %v1161_v40 }
 0x2db   : > { %v1171_v43 = vsel %vm1170_vm2, %v1169_v42, %v1165_v41 }
 0x2dc   : > { %1521 = vmatmul.msk.f32.vlgmr.msra.gmra.mxu0 %vm1180_vm3, %v1171_v43 }
 0x359   : > { %v1201_v45 = vpop.f32.mrf.mxu0 }
 0x35a   : > { %v1202_v47 = vadd.f32 %v1593_v44, %v1201_v45 }
 0x35c   : > { %v1205_v48 = vadd.f32 %v1204_v46, %v1202_v47 }
 0x35e   : > { %v1208_v49 = vsel %vm1180_vm3, %v1205_v48, 0.0 }
 0x35f   : > { %1209 = vadd.xlane.f32.xlu0 %v1208_v49 }
 0x3d2   : > { %v1210_v57 = vpop.xlane.xlu0 %1209 }
 0x3d3   : > { %v1218_v58 = vmul.f32 %v1964_v56, %v1210_v57  ;;  %v1598_v57 = vld [vmem:[%s2108_s18] ss:$0 sm:$0xff] }
 0x3d5   : > { %v1219_v59 = vsub.f32 %v1205_v48, %v1218_v58 }
 0x3d7   : > { %v1220_v60 = vmul.f32 %v1219_v59, %v1219_v59 }
 0x3d9   : > { %v1221_v61 = vsel %vm1180_vm3, %v1220_v60, 0.0 }
 0x3da   : > { %1222 = vadd.xlane.f32.xlu1 %v1221_v61 }
 0x44d   : > { %v1223_v5 = vpop.xlane.xlu1 %1222 }
 0x44e   : > { %v1224_v6 = vmul.f32 %v1223_v5, %v1964_v56 }
 0x450   : > { %v1225_v8 = vadd.f32 1e-05, %v1224_v6 }
 0x452   : > { %1612 = vrsqrt.f32 %v1225_v8  ;;  %vm1232_vm6 = vweird.f32 %v1225_v8 }
 0x458   : > { %v1613_v13 = vpop.eup %1612 }
 0x459   : > { %v1227_v15 = vmul.f32 %v1613_v13, %v1225_v8  ;;  %vm1233_vm5 = vweird.f32 %v1613_v13 }
 0x45a   : > { %vm1234_vm7 = vmor %vm1232_vm6, %vm1233_vm5 }
 0x45b   : > { %v1228_v17 = vmul.f32 %v1613_v13, %v1227_v15 }
 0x45d   : > { %v1229_v19 = vmul.f32 0.5, %v1228_v17 }
 0x45f   : > { %v1230_v21 = vsub.f32 1.5, %v1229_v19 }
 0x461   : > { %v1231_v23 = vmul.f32 %v1613_v13, %v1230_v21 }
 0x463   : > { %v1235_v25 = vsel %vm1234_vm7, %v1613_v13, %v1231_v23 }
 0x464   : > { %v1236_v26 = vmul.f32 %v1235_v25, %v1219_v59  ;;  %v1599_v59 = vld [vmem:[%s2142_s0] ss:$0 sm:$0xff] }
 0x466   : > { %v1240_v28 = vmul.f32 %v1594_v24, %v1236_v26 }
 0x468   : > { %v1244_v29 = vadd.f32 %v1595_v27, %v1240_v28 }
 0x46a   : > { %1522 = vmatmul.msk.f32.vlgmr.msra.gmra.mxu1 %vm1180_vm3, %v1244_v29 }
 0x4e7   : > { %v1273_v34 = vpop.f32.mrf.mxu1 }
 0x4e8   : > { %v1274_v35 = vadd.f32 %v1596_v33, %v1273_v34 }
 0x4ea   : > { %v1276_v36 = vmax.f32 %v1274_v35, 0.0 }
 0x4ec   : > { %1313 = vmatmul.f32.vlgmr.msrb.gmra.mxu2 %v1276_v36 }
 0x56f   : > { %v1314_v38 = vpop.f32.mrf.mxu2 }
 0x570   : > { %v1315_v39 = vadd.f32 %v1597_v37, %v1314_v38 }
 0x572   : > { %v1317_v40 = vadd.f32 %v1315_v39, %v1244_v29 }
 0x574   : > { %v1320_v41 = vsel %vm1180_vm3, %v1317_v40, 0.0 }
 0x575   : > { %1321 = vadd.xlane.f32.xlu2 %v1320_v41 }
 0x5e8   : > { %v1322_v42 = vpop.xlane.xlu2 %1321 }
 0x5e9   : > { %v1323_v43 = vmul.f32 %v1322_v42, %v1964_v56 }
 0x5eb   : > { %v1324_v44 = vsub.f32 %v1317_v40, %v1323_v43 }
 0x5ed   : > { %v1325_v45 = vmul.f32 %v1324_v44, %v1324_v44 }
 0x5ef   : > { %v1326_v46 = vsel %vm1180_vm3, %v1325_v45, 0.0 }
 0x5f0   : > { %1327 = vadd.xlane.f32.xlu2 %v1326_v46 }
 0x663   : > { %v1328_v47 = vpop.xlane.xlu2 %1327 }
 0x664   : > { %v1329_v48 = vmul.f32 %v1328_v47, %v1964_v56 }
 0x666   : > { %v1330_v49 = vadd.f32 1e-05, %v1329_v48 }
 0x668   : > { %1614 = vrsqrt.f32 %v1330_v49  ;;  %vm1337_vm9 = vweird.f32 %v1330_v49 }
 0x66e   : > { %v1615_v50 = vpop.eup %1614 }
 0x66f   : > { %v1332_v51 = vmul.f32 %v1615_v50, %v1330_v49  ;;  %vm1338_vm8 = vweird.f32 %v1615_v50 }
 0x670   : > { %vm1339_vm10 = vmor %vm1337_vm9, %vm1338_vm8 }
 0x671   : > { %v1333_v52 = vmul.f32 %v1615_v50, %v1332_v51 }
 0x673   : > { %v1334_v53 = vmul.f32 0.5, %v1333_v52 }
 0x675   : > { %v1335_v54 = vsub.f32 1.5, %v1334_v53 }
 0x677   : > { %v1336_v55 = vmul.f32 %v1615_v50, %v1335_v54 }
 0x679   : > { %v1340_v56 = vsel %vm1339_vm10, %v1615_v50, %v1336_v55 }
 0x67a   : > { %v1341_v58 = vmul.f32 %v1340_v56, %v1324_v44 }
 0x67c   : > { %v1345_v60 = vmul.f32 %v1598_v57, %v1341_v58 }
 0x67e   : > { %v1349_v61 = vadd.f32 %v1599_v59, %v1345_v60 }
 0x680   : > { %1350 = vst.msk [vmem:[%s712_s26] sm:$0xff] %vm1180_vm3, %v1349_v61 }
 0x681   : > { %1643 = shalt.err (!%p1640_p5)
}
 0x682   : > { %1527 = dma.vmem_to_hbm [thread:$0]  (%p1849_p4), %s1366_s24, 128, %s1368_s29, %s1352_s21  }
 0x683 PF: > { %s2143_s28 = sld [smem:[#allocation10_spill]] }
 0x684   : > { %s2144_s30 = sld [smem:[#allocation7_spill]] }
 0x689   : > { %p1533_p6 = scmp.ge.s32.totalorder %s2143_s28, 2 }
 0x68a   : > { %s1379_s26 = sand.u32 1, %s2144_s30  }
 0x68b   : > { %p1530_p7 = pnand %p1533_p6, %p1856_p8  ;;  %s1380_s23 = scalar_lea.sflag [#allocation5], %s1379_s26 }
 0x68d   : > { %p1531_p9 = pneg %p1530_p7 }
 0x68f   : > { %1669 = dma.done.wait (%p1531_p9), %s1380_s23, 128  }
 0x690   : > { %1671 = vsyncadd (%p1531_p9), %s1380_s23, 4294967168  ;;  %s33_s25 = sadd.s32 1, %s2143_s28   ;;  %s2146_s3 = sld [smem:[#allocation8_spill]] }
 0x691   : > { %p30_p10 = scmp.ge.s32.totalorder %s33_s25, 4   ;;  %s2147_s23 = sld [smem:[#allocation14_spill]] }
 0x692   : > { %s2148_s24 = sld [smem:[#allocation9_spill]]  ;;  %s2150_s1 = smov %s1678_s22 }
 0x693   : > { %s2149_s2 = sld [smem:[#allocation11_spill]]  ;;  %32 = sbr.rel (!%p30_p10) target bundleno = 11 (0xb), region = 152 }
 0x696   : > { %s2151_s22 = smov %s2146_s3 }
 0x698   :  { %1386 = vsyncpa [#allocation5], 1 }
 0x699   :  { %1388 = vsyncpa [#allocation5 + $0x1], 1 }

</bundles_post_ra>
